<compile_context>
chip_gen: v7x
topology: tpu7x:2x2x1
jax: 0.10.0
libtpu: 0.0.40
codegen_flags: <defaults>
</compile_context>

<pallas_src>
import math
import functools

import jax
import jax.numpy as jnp
from jax import lax
from jax.experimental import pallas as pl
from jax.experimental.pallas import tpu as pltpu


def _round_up(x, m):
    return ((x + m - 1) // m) * m


def _default_tuning(d_embed):
    """Generation-aware (q_tile, vmem_limit_bytes) defaults."""
    try:
        kind = jax.devices()[0].device_kind.lower()
    except Exception:
        kind = ""
    if ("v5" in kind) or ("v6" in kind):
        # 128 MiB physical VMEM: big tiles amortize per-step overhead.
        return (512 if d_embed <= 640 else 384), 100 * 1024 * 1024
    # v7x (64 MiB physical VMEM per core) or unknown: stay conservative.
    return (512 if d_embed <= 640 else 256), 56 * 1024 * 1024


def cross_attention_kernel(x_ref, kt_ref, v_ref,
                           wq_ref, bq_ref, wo_ref, bo_ref,
                           o_ref,
                           q_scratch, acc_scratch,
                           *, n_heads, d_head, lkv, compute_dtype, approx_recip):
    # --- Q projection for this query tile (scale already folded into wq/bq) ----
    x = x_ref[0]                                                       # (TQ, d_embed)
    q = jnp.dot(x, wq_ref[...], preferred_element_type=jnp.float32) + bq_ref[...]
    q_scratch[...] = q.astype(compute_dtype)                          # bound live range in VMEM
    acc_scratch[...] = jnp.zeros_like(acc_scratch)                    # f32 out-proj accumulator

    lkv_p = kt_ref.shape[-1]
    if lkv_p != lkv:
        # Mask padded key positions with a large negative bias (exp -> 0).
        col = lax.broadcasted_iota(jnp.int32, (1, lkv_p), 1)
        key_bias = jnp.where(col < lkv, 0.0, -1e30).astype(jnp.float32)
    else:
        key_bias = None

    # --- Per-head attention; n_heads is static and small, so this unrolls with
    #     all slice offsets compile-time constant.  K^T / V are head-major inputs,
    #     so per-head access is a leading-axis index (no lane slicing of K/V). ---
    for h in range(n_heads):
        lo = h * d_head
        qh = q_scratch[:, lo:lo + d_head]                              # (TQ, d_head)
        kth = kt_ref[0, h]                                             # (d_head, Lkv_p)  pre-transposed
        vhh = v_ref[0, h]                                              # (Lkv_p, d_head)

        # scores = qh @ K_h^T : natural MXU layout, f32 accumulation.
        s = jnp.dot(qh, kth, preferred_element_type=jnp.float32)       # (TQ, Lkv_p)
        if key_bias is not None:
            s = s + key_bias

        s = s - jnp.max(s, axis=-1, keepdims=True)
        p = jnp.exp(s)
        denom = jnp.sum(p, axis=-1, keepdims=True)                     # (TQ, 1)

        # Unnormalized P @ V, deferred normalization via the EUP reciprocal.
        oh = jnp.dot(p.astype(compute_dtype), vhh,
                     preferred_element_type=jnp.float32)               # (TQ, d_head)
        oh = oh * pl.reciprocal(denom, approx=approx_recip)

        # Per-head output projection accumulation: wo row-slice is sublane-aligned
        # (d_head % 8 == 0), so no masked lane stores and no head-concat scratch.
        acc_scratch[...] += jnp.dot(oh.astype(compute_dtype),
                                    wo_ref[lo:lo + d_head, :],
                                    preferred_element_type=jnp.float32)

    o_ref[0] = (acc_scratch[...] + bo_ref[...]).astype(o_ref.dtype)


def cross_attention(x, y, params, n_heads, *,
                    compute_dtype=jnp.bfloat16, q_tile=None, vmem_limit_bytes=None):
    """x: (B, Lq, d_embed), y: (B, Lkv, d_cross). Returns (B, Lq, d_embed)."""
    B, Lq, d_embed = x.shape
    _, Lkv, d_cross = y.shape
    d_head = d_embed // n_heads
    out_dtype = x.dtype
    scale = 1.0 / math.sqrt(d_head)

    auto_tile, auto_vmem = _default_tuning(d_embed)
    if q_tile is None:
        q_tile = auto_tile
    if vmem_limit_bytes is None:
        vmem_limit_bytes = auto_vmem

    # bf16 packs two rows per sublane -> keep query tiles a multiple of 16.
    sub = 16 if compute_dtype == jnp.bfloat16 else 8
    tq = _round_up(min(q_tile, _round_up(Lq, sub)), sub)
    lq_p = _round_up(Lq, tq)
    lkv_p = _round_up(Lkv, 128)        # lane-dense score matrix; padded keys masked
    num_q_tiles = lq_p // tq

    # PyTorch Linear: out = x @ W.T + b with W of shape (out, in).
    # Pre-transpose to (in, out), cast to compute dtype, fold scale into Q proj.
    wq = (params["wq"].T * scale).astype(compute_dtype)
    wo = params["wo"].T.astype(compute_dtype)
    bq = (params["bq"] * scale).reshape(1, d_embed).astype(jnp.float32)
    bo = params["bo"].reshape(1, d_embed).astype(jnp.float32)

    # --- Hoisted K/V projections (negligible FLOPs) -> head-major layouts ------
    yc = y.astype(compute_dtype)
    wk = params["wk"].T.astype(compute_dtype)
    wv = params["wv"].T.astype(compute_dtype)
    k = jnp.einsum("bld,de->ble", yc, wk,
                   preferred_element_type=jnp.float32) + params["bk"]
    v = jnp.einsum("bld,de->ble", yc, wv,
                   preferred_element_type=jnp.float32) + params["bv"]
    k = k.reshape(B, Lkv, n_heads, d_head).astype(compute_dtype)
    v = v.reshape(B, Lkv, n_heads, d_head).astype(compute_dtype)
    kt = jnp.transpose(k, (0, 2, 3, 1))          # (B, H, d_head, Lkv)  == K^T per head
    vh = jnp.transpose(v, (0, 2, 1, 3))          # (B, H, Lkv, d_head)
    if lkv_p != Lkv:
        kt = jnp.pad(kt, ((0, 0), (0, 0), (0, 0), (0, lkv_p - Lkv)))
        vh = jnp.pad(vh, ((0, 0), (0, 0), (0, lkv_p - Lkv), (0, 0)))

    xc = x.astype(compute_dtype)
    if lq_p != Lq:
        xc = jnp.pad(xc, ((0, 0), (0, lq_p - Lq), (0, 0)))

    kernel = functools.partial(
        cross_attention_kernel,
        n_heads=n_heads, d_head=d_head, lkv=Lkv,
        compute_dtype=compute_dtype,
        approx_recip=(compute_dtype != jnp.float32))

    # Constant-index full blocks: DMA'd once; single-buffered to halve their VMEM.
    def const_spec(shape):
        return pl.BlockSpec(shape, lambda b, t: (0,) * len(shape),
                            pipeline_mode=pl.Buffered(1))

    out = pl.pallas_call(
        kernel,
        out_shape=jax.ShapeDtypeStruct((B, lq_p, d_embed), out_dtype),
        grid_spec=pltpu.PrefetchScalarGridSpec(
            num_scalar_prefetch=0,
            grid=(B, num_q_tiles),
            in_specs=[
                pl.BlockSpec((1, tq, d_embed), lambda b, t: (b, t, 0)),          # x tile
                pl.BlockSpec((1, n_heads, d_head, lkv_p),
                             lambda b, t: (b, 0, 0, 0)),                         # K^T (per batch)
                pl.BlockSpec((1, n_heads, lkv_p, d_head),
                             lambda b, t: (b, 0, 0, 0)),                         # V   (per batch)
                const_spec((d_embed, d_embed)),   # wq
                const_spec((1, d_embed)),         # bq
                const_spec((d_embed, d_embed)),   # wo
                const_spec((1, d_embed)),         # bo
            ],
            out_specs=pl.BlockSpec((1, tq, d_embed), lambda b, t: (b, t, 0)),
            scratch_shapes=[
                pltpu.VMEM((tq, d_embed), compute_dtype),   # q tile
                pltpu.VMEM((tq, d_embed), jnp.float32),     # out-projection accumulator
            ],
        ),
        compiler_params=pltpu.CompilerParams(
            # No carried state -> both axes shardable across TensorCores.
            dimension_semantics=("parallel", "parallel"),
            vmem_limit_bytes=vmem_limit_bytes,
        ),
    )(xc, kt, vh, wq, bq, wo, bo)

    if lq_p != Lq:
        out = out[:, :Lq, :]
    return out


def cross_attention_ref(x, y, params, n_heads):
    """Pure-JAX f32 reference mirroring the PyTorch forward."""
    B, Lq, d_embed = x.shape
    d_head = d_embed // n_heads
    q = x @ params["wq"].T + params["bq"]
    k = y @ params["wk"].T + params["bk"]
    v = y @ params["wv"].T + params["bv"]
    q = q.reshape(B, Lq, n_heads, d_head).transpose(0, 2, 1, 3)
    k = k.reshape(B, -1, n_heads, d_head).transpose(0, 2, 1, 3)
    v = v.reshape(B, -1, n_heads, d_head).transpose(0, 2, 1, 3)
    w = (q @ jnp.swapaxes(k, -1, -2)) / math.sqrt(d_head)
    w = jax.nn.softmax(w, axis=-1)
    o = w @ v
    o = o.transpose(0, 2, 1, 3).reshape(B, Lq, d_embed)
    return o @ params["wo"].T + params["bo"]


if __name__ == "__main__":
    # Small shapes consistent with the module's forward.
    B, Lq, Lkv = 2, 16, 8
    n_heads, d_embed, d_cross = 4, 32, 24

    key = jax.random.PRNGKey(0)
    keys = jax.random.split(key, 10)

    params = {
        "wq": 0.05 * jax.random.normal(keys[0], (d_embed, d_embed), jnp.float32),
        "bq": 0.05 * jax.random.normal(keys[1], (d_embed,), jnp.float32),
        "wk": 0.05 * jax.random.normal(keys[2], (d_embed, d_cross), jnp.float32),
        "bk": 0.05 * jax.random.normal(keys[3], (d_embed,), jnp.float32),
        "wv": 0.05 * jax.random.normal(keys[4], (d_embed, d_cross), jnp.float32),
        "bv": 0.05 * jax.random.normal(keys[5], (d_embed,), jnp.float32),
        "wo": 0.05 * jax.random.normal(keys[6], (d_embed, d_embed), jnp.float32),
        "bo": 0.05 * jax.random.normal(keys[7], (d_embed,), jnp.float32),
    }

    x = jax.random.normal(keys[8], (B, Lq, d_embed), jnp.float32)
    y = jax.random.normal(keys[9], (B, Lkv, d_cross), jnp.float32)

    ref = cross_attention_ref(x, y, params, n_heads)

    # Default (bf16 matmul inputs, f32 accumulation).
    out_bf16 = jax.block_until_ready(cross_attention(x, y, params, n_heads))
    assert out_bf16.shape == (B, Lq, d_embed)
    assert jnp.allclose(out_bf16, ref, atol=2e-2, rtol=2e-2), \
        "bf16 kernel mismatch vs pure-JAX reference"

    # Full f32 compute path (exact reciprocal) for a tight numerical check.
    out_f32 = jax.block_until_ready(
        cross_attention(x, y, params, n_heads, compute_dtype=jnp.float32))
    assert jnp.allclose(out_f32, ref, atol=1e-3, rtol=1e-3), \
        "f32 kernel mismatch vs pure-JAX reference"

    print("KERNEL_OK")
</pallas_src>

<mosaic_0001>
module attributes {stable_mosaic.version = 11 : i64} {
  func.func @cross_attention_kernel(%arg0: i32, %arg1: i32, %arg2: memref<1x16x32xbf16, #tpu.memory_space<vmem>>, %arg3: memref<1x4x8x128xbf16, #tpu.memory_space<vmem>>, %arg4: memref<1x4x128x8xbf16, #tpu.memory_space<vmem>>, %arg5: memref<32x32xbf16, #tpu.memory_space<vmem>>, %arg6: memref<1x32xf32, #tpu.memory_space<vmem>>, %arg7: memref<32x32xbf16, #tpu.memory_space<vmem>>, %arg8: memref<1x32xf32, #tpu.memory_space<vmem>>, %arg9: memref<1x16x32xf32, #tpu.memory_space<vmem>>, %arg10: memref<16x32xbf16, #tpu.memory_space<vmem>>, %arg11: memref<16x32xf32, #tpu.memory_space<vmem>>) attributes {dimension_semantics = [#tpu.dimension_semantics<parallel>, #tpu.dimension_semantics<parallel>], iteration_bounds = array<i64: 2, 1>, scalar_prefetch = 0 : i64, scratch_operands = 2 : i64, tpu.core_type = #tpu.core_type<tc>, window_params = [{transform_indices = @transform_0, window_bounds = array<i64: 1, 16, 32>}, {transform_indices = @transform_1, window_bounds = array<i64: 1, 4, 8, 128>}, {transform_indices = @transform_2, window_bounds = array<i64: 1, 4, 128, 8>}, {pipeline_mode = #tpu.pipeline_mode<synchronous>, transform_indices = @transform_3, window_bounds = array<i64: 32, 32>}, {pipeline_mode = #tpu.pipeline_mode<synchronous>, transform_indices = @transform_4, window_bounds = array<i64: 1, 32>}, {pipeline_mode = #tpu.pipeline_mode<synchronous>, transform_indices = @transform_5, window_bounds = array<i64: 32, 32>}, {pipeline_mode = #tpu.pipeline_mode<synchronous>, transform_indices = @transform_6, window_bounds = array<i64: 1, 32>}, {transform_indices = @transform_7, window_bounds = array<i64: 1, 16, 32>}]} {
    %c0 = arith.constant 0 : index
    %c0_0 = arith.constant 0 : index
    %c0_1 = arith.constant 0 : index
    %0 = vector.load %arg2[%c0, %c0_0, %c0_1] : memref<1x16x32xbf16, #tpu.memory_space<vmem>>, vector<1x16x32xbf16>
    %1 = vector.shape_cast %0 : vector<1x16x32xbf16> to vector<16x32xbf16>
    %c0_2 = arith.constant 0 : index
    %c0_3 = arith.constant 0 : index
    %2 = vector.load %arg5[%c0_2, %c0_3] : memref<32x32xbf16, #tpu.memory_space<vmem>>, vector<32x32xbf16>
    %cst = arith.constant dense<0.000000e+00> : vector<16x32xf32>
    %3 = tpu.matmul %1, %2, %cst {dimension_numbers = #tpu.dot_dimension_numbers<[1], [0], [0], [1], [0, 0, 1, 1], [], []>} : vector<16x32xbf16>, vector<32x32xbf16>, vector<16x32xf32> -> vector<16x32xf32>
    %c0_4 = arith.constant 0 : index
    %c0_5 = arith.constant 0 : index
    %4 = vector.load %arg6[%c0_4, %c0_5] : memref<1x32xf32, #tpu.memory_space<vmem>>, vector<1x32xf32>
    %5 = vector.broadcast %4 : vector<1x32xf32> to vector<16x32xf32>
    %6 = arith.addf %3, %5 : vector<16x32xf32>
    %7 = arith.truncf %6 : vector<16x32xf32> to vector<16x32xbf16>
    %c0_6 = arith.constant 0 : index
    %c0_7 = arith.constant 0 : index
    %8 = vector.load %arg10[%c0_6, %c0_7] : memref<16x32xbf16, #tpu.memory_space<vmem>>, vector<16x32xbf16>
    tpu.vector_store %arg10[%c0_6, %c0_7], %7 {strides = array<i32>} : memref<16x32xbf16, #tpu.memory_space<vmem>>, vector<16x32xbf16>,
    %cst_8 = arith.constant 0.000000e+00 : f32
    %9 = vector.broadcast %cst_8 : f32 to vector<16x32xf32>
    %c0_9 = arith.constant 0 : index
    %c0_10 = arith.constant 0 : index
    %10 = vector.load %arg11[%c0_9, %c0_10] : memref<16x32xf32, #tpu.memory_space<vmem>>, vector<16x32xf32>
    tpu.vector_store %arg11[%c0_9, %c0_10], %9 {strides = array<i32>} : memref<16x32xf32, #tpu.memory_space<vmem>>, vector<16x32xf32>,
    %11 = tpu.iota {dimensions = array<i32: 1>} : vector<1x128xi32>
    %c8_i32 = arith.constant 8 : i32
    %12 = vector.broadcast %c8_i32 : i32 to vector<1x128xi32>
    %13 = arith.cmpi slt, %11, %12 : vector<1x128xi32>
    %cst_11 = arith.constant 0.000000e+00 : f32
    %cst_12 = arith.constant -1.000000e+30 : f32
    %14 = vector.broadcast %cst_11 : f32 to vector<1x128xf32>
    %15 = vector.broadcast %cst_12 : f32 to vector<1x128xf32>
    %16 = arith.select %13, %14, %15 : vector<1x128xi1>, vector<1x128xf32>
    %c0_13 = arith.constant 0 : index
    %c0_14 = arith.constant 0 : index
    %17 = vector.load %arg10[%c0_13, %c0_14] : memref<16x32xbf16, #tpu.memory_space<vmem>>, vector<16x8xbf16>
    %c0_15 = arith.constant 0 : index
    %c0_16 = arith.constant 0 : index
    %c0_17 = arith.constant 0 : index
    %c0_18 = arith.constant 0 : index
    %18 = vector.load %arg3[%c0_15, %c0_16, %c0_17, %c0_18] : memref<1x4x8x128xbf16, #tpu.memory_space<vmem>>, vector<1x1x8x128xbf16>
    %19 = vector.shape_cast %18 : vector<1x1x8x128xbf16> to vector<8x128xbf16>
    %c0_19 = arith.constant 0 : index
    %c0_20 = arith.constant 0 : index
    %c0_21 = arith.constant 0 : index
    %c0_22 = arith.constant 0 : index
    %20 = vector.load %arg4[%c0_19, %c0_20, %c0_21, %c0_22] : memref<1x4x128x8xbf16, #tpu.memory_space<vmem>>, vector<1x1x128x8xbf16>
    %21 = vector.shape_cast %20 : vector<1x1x128x8xbf16> to vector<128x8xbf16>
    %cst_23 = arith.constant dense<0.000000e+00> : vector<16x128xf32>
    %22 = tpu.matmul %17, %19, %cst_23 {dimension_numbers = #tpu.dot_dimension_numbers<[1], [0], [0], [1], [0, 0, 1, 1], [], []>} : vector<16x8xbf16>, vector<8x128xbf16>, vector<16x128xf32> -> vector<16x128xf32>
    %23 = vector.broadcast %16 : vector<1x128xf32> to vector<16x128xf32>
    %24 = arith.addf %22, %23 : vector<16x128xf32>
    %cst_24 = arith.constant dense<0xFF800000> : vector<16xf32>
    %25 = vector.multi_reduction <maximumf>, %24, %cst_24 [1] : vector<16x128xf32> to vector<16xf32>
    %26 = vector.shape_cast %25 : vector<16xf32> to vector<16x1xf32>
    %27 = vector.broadcast %26 : vector<16x1xf32> to vector<16x128xf32>
    %28 = arith.subf %24, %27 : vector<16x128xf32>
    %29 = math.exp %28 : vector<16x128xf32>
    %cst_25 = arith.constant dense<0.000000e+00> : vector<16xf32>
    %30 = vector.multi_reduction <add>, %29, %cst_25 [1] : vector<16x128xf32> to vector<16xf32>
    %31 = vector.shape_cast %30 : vector<16xf32> to vector<16x1xf32>
    %32 = arith.truncf %29 : vector<16x128xf32> to vector<16x128xbf16>
    %cst_26 = arith.constant dense<0.000000e+00> : vector<16x8xf32>
    %33 = tpu.matmul %32, %21, %cst_26 {dimension_numbers = #tpu.dot_dimension_numbers<[1], [0], [0], [1], [0, 0, 1, 1], [], []>} : vector<16x128xbf16>, vector<128x8xbf16>, vector<16x8xf32> -> vector<16x8xf32>
    %34 = tpu.reciprocal %31 {approx = true} : vector<16x1xf32> -> vector<16x1xf32>
    %35 = vector.broadcast %34 : vector<16x1xf32> to vector<16x8xf32>
    %36 = arith.mulf %33, %35 : vector<16x8xf32>
    %c0_27 = arith.constant 0 : index
    %c0_28 = arith.constant 0 : index
    %37 = vector.load %arg11[%c0_27, %c0_28] : memref<16x32xf32, #tpu.memory_space<vmem>>, vector<16x32xf32>
    %38 = arith.truncf %36 : vector<16x8xf32> to vector<16x8xbf16>
    %c0_29 = arith.constant 0 : index
    %c0_30 = arith.constant 0 : index
    %39 = vector.load %arg7[%c0_29, %c0_30] : memref<32x32xbf16, #tpu.memory_space<vmem>>, vector<8x32xbf16>
    %cst_31 = arith.constant dense<0.000000e+00> : vector<16x32xf32>
    %40 = tpu.matmul %38, %39, %cst_31 {dimension_numbers = #tpu.dot_dimension_numbers<[1], [0], [0], [1], [0, 0, 1, 1], [], []>} : vector<16x8xbf16>, vector<8x32xbf16>, vector<16x32xf32> -> vector<16x32xf32>
    %41 = arith.addf %37, %40 : vector<16x32xf32>
    %c0_32 = arith.constant 0 : index
    %c0_33 = arith.constant 0 : index
    %42 = vector.load %arg11[%c0_32, %c0_33] : memref<16x32xf32, #tpu.memory_space<vmem>>, vector<16x32xf32>
    tpu.vector_store %arg11[%c0_32, %c0_33], %41 {strides = array<i32>} : memref<16x32xf32, #tpu.memory_space<vmem>>, vector<16x32xf32>,
    %c0_34 = arith.constant 0 : index
    %c8 = arith.constant 8 : index
    %43 = vector.load %arg10[%c0_34, %c8] : memref<16x32xbf16, #tpu.memory_space<vmem>>, vector<16x8xbf16>
    %c0_35 = arith.constant 0 : index
    %c1 = arith.constant 1 : index
    %c0_36 = arith.constant 0 : index
    %c0_37 = arith.constant 0 : index
    %44 = vector.load %arg3[%c0_35, %c1, %c0_36, %c0_37] : memref<1x4x8x128xbf16, #tpu.memory_space<vmem>>, vector<1x1x8x128xbf16>
    %45 = vector.shape_cast %44 : vector<1x1x8x128xbf16> to vector<8x128xbf16>
    %c0_38 = arith.constant 0 : index
    %c1_39 = arith.constant 1 : index
    %c0_40 = arith.constant 0 : index
    %c0_41 = arith.constant 0 : index
    %46 = vector.load %arg4[%c0_38, %c1_39, %c0_40, %c0_41] : memref<1x4x128x8xbf16, #tpu.memory_space<vmem>>, vector<1x1x128x8xbf16>
    %47 = vector.shape_cast %46 : vector<1x1x128x8xbf16> to vector<128x8xbf16>
    %cst_42 = arith.constant dense<0.000000e+00> : vector<16x128xf32>
    %48 = tpu.matmul %43, %45, %cst_42 {dimension_numbers = #tpu.dot_dimension_numbers<[1], [0], [0], [1], [0, 0, 1, 1], [], []>} : vector<16x8xbf16>, vector<8x128xbf16>, vector<16x128xf32> -> vector<16x128xf32>
    %49 = vector.broadcast %16 : vector<1x128xf32> to vector<16x128xf32>
    %50 = arith.addf %48, %49 : vector<16x128xf32>
    %cst_43 = arith.constant dense<0xFF800000> : vector<16xf32>
    %51 = vector.multi_reduction <maximumf>, %50, %cst_43 [1] : vector<16x128xf32> to vector<16xf32>
    %52 = vector.shape_cast %51 : vector<16xf32> to vector<16x1xf32>
    %53 = vector.broadcast %52 : vector<16x1xf32> to vector<16x128xf32>
    %54 = arith.subf %50, %53 : vector<16x128xf32>
    %55 = math.exp %54 : vector<16x128xf32>
    %cst_44 = arith.constant dense<0.000000e+00> : vector<16xf32>
    %56 = vector.multi_reduction <add>, %55, %cst_44 [1] : vector<16x128xf32> to vector<16xf32>
    %57 = vector.shape_cast %56 : vector<16xf32> to vector<16x1xf32>
    %58 = arith.truncf %55 : vector<16x128xf32> to vector<16x128xbf16>
    %cst_45 = arith.constant dense<0.000000e+00> : vector<16x8xf32>
    %59 = tpu.matmul %58, %47, %cst_45 {dimension_numbers = #tpu.dot_dimension_numbers<[1], [0], [0], [1], [0, 0, 1, 1], [], []>} : vector<16x128xbf16>, vector<128x8xbf16>, vector<16x8xf32> -> vector<16x8xf32>
    %60 = tpu.reciprocal %57 {approx = true} : vector<16x1xf32> -> vector<16x1xf32>
    %61 = vector.broadcast %60 : vector<16x1xf32> to vector<16x8xf32>
    %62 = arith.mulf %59, %61 : vector<16x8xf32>
    %c0_46 = arith.constant 0 : index
    %c0_47 = arith.constant 0 : index
    %63 = vector.load %arg11[%c0_46, %c0_47] : memref<16x32xf32, #tpu.memory_space<vmem>>, vector<16x32xf32>
    %64 = arith.truncf %62 : vector<16x8xf32> to vector<16x8xbf16>
    %c8_48 = arith.constant 8 : index
    %c0_49 = arith.constant 0 : index
    %65 = vector.load %arg7[%c8_48, %c0_49] : memref<32x32xbf16, #tpu.memory_space<vmem>>, vector<8x32xbf16>
    %cst_50 = arith.constant dense<0.000000e+00> : vector<16x32xf32>
    %66 = tpu.matmul %64, %65, %cst_50 {dimension_numbers = #tpu.dot_dimension_numbers<[1], [0], [0], [1], [0, 0, 1, 1], [], []>} : vector<16x8xbf16>, vector<8x32xbf16>, vector<16x32xf32> -> vector<16x32xf32>
    %67 = arith.addf %63, %66 : vector<16x32xf32>
    %c0_51 = arith.constant 0 : index
    %c0_52 = arith.constant 0 : index
    %68 = vector.load %arg11[%c0_51, %c0_52] : memref<16x32xf32, #tpu.memory_space<vmem>>, vector<16x32xf32>
    tpu.vector_store %arg11[%c0_51, %c0_52], %67 {strides = array<i32>} : memref<16x32xf32, #tpu.memory_space<vmem>>, vector<16x32xf32>,
    %c0_53 = arith.constant 0 : index
    %c16 = arith.constant 16 : index
    %69 = vector.load %arg10[%c0_53, %c16] : memref<16x32xbf16, #tpu.memory_space<vmem>>, vector<16x8xbf16>
    %c0_54 = arith.constant 0 : index
    %c2 = arith.constant 2 : index
    %c0_55 = arith.constant 0 : index
    %c0_56 = arith.constant 0 : index
    %70 = vector.load %arg3[%c0_54, %c2, %c0_55, %c0_56] : memref<1x4x8x128xbf16, #tpu.memory_space<vmem>>, vector<1x1x8x128xbf16>
    %71 = vector.shape_cast %70 : vector<1x1x8x128xbf16> to vector<8x128xbf16>
    %c0_57 = arith.constant 0 : index
    %c2_58 = arith.constant 2 : index
    %c0_59 = arith.constant 0 : index
    %c0_60 = arith.constant 0 : index
    %72 = vector.load %arg4[%c0_57, %c2_58, %c0_59, %c0_60] : memref<1x4x128x8xbf16, #tpu.memory_space<vmem>>, vector<1x1x128x8xbf16>
    %73 = vector.shape_cast %72 : vector<1x1x128x8xbf16> to vector<128x8xbf16>
    %cst_61 = arith.constant dense<0.000000e+00> : vector<16x128xf32>
    %74 = tpu.matmul %69, %71, %cst_61 {dimension_numbers = #tpu.dot_dimension_numbers<[1], [0], [0], [1], [0, 0, 1, 1], [], []>} : vector<16x8xbf16>, vector<8x128xbf16>, vector<16x128xf32> -> vector<16x128xf32>
    %75 = vector.broadcast %16 : vector<1x128xf32> to vector<16x128xf32>
    %76 = arith.addf %74, %75 : vector<16x128xf32>
    %cst_62 = arith.constant dense<0xFF800000> : vector<16xf32>
    %77 = vector.multi_reduction <maximumf>, %76, %cst_62 [1] : vector<16x128xf32> to vector<16xf32>
    %78 = vector.shape_cast %77 : vector<16xf32> to vector<16x1xf32>
    %79 = vector.broadcast %78 : vector<16x1xf32> to vector<16x128xf32>
    %80 = arith.subf %76, %79 : vector<16x128xf32>
    %81 = math.exp %80 : vector<16x128xf32>
    %cst_63 = arith.constant dense<0.000000e+00> : vector<16xf32>
    %82 = vector.multi_reduction <add>, %81, %cst_63 [1] : vector<16x128xf32> to vector<16xf32>
    %83 = vector.shape_cast %82 : vector<16xf32> to vector<16x1xf32>
    %84 = arith.truncf %81 : vector<16x128xf32> to vector<16x128xbf16>
    %cst_64 = arith.constant dense<0.000000e+00> : vector<16x8xf32>
    %85 = tpu.matmul %84, %73, %cst_64 {dimension_numbers = #tpu.dot_dimension_numbers<[1], [0], [0], [1], [0, 0, 1, 1], [], []>} : vector<16x128xbf16>, vector<128x8xbf16>, vector<16x8xf32> -> vector<16x8xf32>
    %86 = tpu.reciprocal %83 {approx = true} : vector<16x1xf32> -> vector<16x1xf32>
    %87 = vector.broadcast %86 : vector<16x1xf32> to vector<16x8xf32>
    %88 = arith.mulf %85, %87 : vector<16x8xf32>
    %c0_65 = arith.constant 0 : index
    %c0_66 = arith.constant 0 : index
    %89 = vector.load %arg11[%c0_65, %c0_66] : memref<16x32xf32, #tpu.memory_space<vmem>>, vector<16x32xf32>
    %90 = arith.truncf %88 : vector<16x8xf32> to vector<16x8xbf16>
    %c16_67 = arith.constant 16 : index
    %c0_68 = arith.constant 0 : index
    %91 = vector.load %arg7[%c16_67, %c0_68] : memref<32x32xbf16, #tpu.memory_space<vmem>>, vector<8x32xbf16>
    %cst_69 = arith.constant dense<0.000000e+00> : vector<16x32xf32>
    %92 = tpu.matmul %90, %91, %cst_69 {dimension_numbers = #tpu.dot_dimension_numbers<[1], [0], [0], [1], [0, 0, 1, 1], [], []>} : vector<16x8xbf16>, vector<8x32xbf16>, vector<16x32xf32> -> vector<16x32xf32>
    %93 = arith.addf %89, %92 : vector<16x32xf32>
    %c0_70 = arith.constant 0 : index
    %c0_71 = arith.constant 0 : index
    %94 = vector.load %arg11[%c0_70, %c0_71] : memref<16x32xf32, #tpu.memory_space<vmem>>, vector<16x32xf32>
    tpu.vector_store %arg11[%c0_70, %c0_71], %93 {strides = array<i32>} : memref<16x32xf32, #tpu.memory_space<vmem>>, vector<16x32xf32>,
    %c0_72 = arith.constant 0 : index
    %c24 = arith.constant 24 : index
    %95 = vector.load %arg10[%c0_72, %c24] : memref<16x32xbf16, #tpu.memory_space<vmem>>, vector<16x8xbf16>
    %c0_73 = arith.constant 0 : index
    %c3 = arith.constant 3 : index
    %c0_74 = arith.constant 0 : index
    %c0_75 = arith.constant 0 : index
    %96 = vector.load %arg3[%c0_73, %c3, %c0_74, %c0_75] : memref<1x4x8x128xbf16, #tpu.memory_space<vmem>>, vector<1x1x8x128xbf16>
    %97 = vector.shape_cast %96 : vector<1x1x8x128xbf16> to vector<8x128xbf16>
    %c0_76 = arith.constant 0 : index
    %c3_77 = arith.constant 3 : index
    %c0_78 = arith.constant 0 : index
    %c0_79 = arith.constant 0 : index
    %98 = vector.load %arg4[%c0_76, %c3_77, %c0_78, %c0_79] : memref<1x4x128x8xbf16, #tpu.memory_space<vmem>>, vector<1x1x128x8xbf16>
    %99 = vector.shape_cast %98 : vector<1x1x128x8xbf16> to vector<128x8xbf16>
    %cst_80 = arith.constant dense<0.000000e+00> : vector<16x128xf32>
    %100 = tpu.matmul %95, %97, %cst_80 {dimension_numbers = #tpu.dot_dimension_numbers<[1], [0], [0], [1], [0, 0, 1, 1], [], []>} : vector<16x8xbf16>, vector<8x128xbf16>, vector<16x128xf32> -> vector<16x128xf32>
    %101 = vector.broadcast %16 : vector<1x128xf32> to vector<16x128xf32>
    %102 = arith.addf %100, %101 : vector<16x128xf32>
    %cst_81 = arith.constant dense<0xFF800000> : vector<16xf32>
    %103 = vector.multi_reduction <maximumf>, %102, %cst_81 [1] : vector<16x128xf32> to vector<16xf32>
    %104 = vector.shape_cast %103 : vector<16xf32> to vector<16x1xf32>
    %105 = vector.broadcast %104 : vector<16x1xf32> to vector<16x128xf32>
    %106 = arith.subf %102, %105 : vector<16x128xf32>
    %107 = math.exp %106 : vector<16x128xf32>
    %cst_82 = arith.constant dense<0.000000e+00> : vector<16xf32>
    %108 = vector.multi_reduction <add>, %107, %cst_82 [1] : vector<16x128xf32> to vector<16xf32>
    %109 = vector.shape_cast %108 : vector<16xf32> to vector<16x1xf32>
    %110 = arith.truncf %107 : vector<16x128xf32> to vector<16x128xbf16>
    %cst_83 = arith.constant dense<0.000000e+00> : vector<16x8xf32>
    %111 = tpu.matmul %110, %99, %cst_83 {dimension_numbers = #tpu.dot_dimension_numbers<[1], [0], [0], [1], [0, 0, 1, 1], [], []>} : vector<16x128xbf16>, vector<128x8xbf16>, vector<16x8xf32> -> vector<16x8xf32>
    %112 = tpu.reciprocal %109 {approx = true} : vector<16x1xf32> -> vector<16x1xf32>
    %113 = vector.broadcast %112 : vector<16x1xf32> to vector<16x8xf32>
    %114 = arith.mulf %111, %113 : vector<16x8xf32>
    %c0_84 = arith.constant 0 : index
    %c0_85 = arith.constant 0 : index
    %115 = vector.load %arg11[%c0_84, %c0_85] : memref<16x32xf32, #tpu.memory_space<vmem>>, vector<16x32xf32>
    %116 = arith.truncf %114 : vector<16x8xf32> to vector<16x8xbf16>
    %c24_86 = arith.constant 24 : index
    %c0_87 = arith.constant 0 : index
    %117 = vector.load %arg7[%c24_86, %c0_87] : memref<32x32xbf16, #tpu.memory_space<vmem>>, vector<8x32xbf16>
    %cst_88 = arith.constant dense<0.000000e+00> : vector<16x32xf32>
    %118 = tpu.matmul %116, %117, %cst_88 {dimension_numbers = #tpu.dot_dimension_numbers<[1], [0], [0], [1], [0, 0, 1, 1], [], []>} : vector<16x8xbf16>, vector<8x32xbf16>, vector<16x32xf32> -> vector<16x32xf32>
    %119 = arith.addf %115, %118 : vector<16x32xf32>
    %c0_89 = arith.constant 0 : index
    %c0_90 = arith.constant 0 : index
    %120 = vector.load %arg11[%c0_89, %c0_90] : memref<16x32xf32, #tpu.memory_space<vmem>>, vector<16x32xf32>
    tpu.vector_store %arg11[%c0_89, %c0_90], %119 {strides = array<i32>} : memref<16x32xf32, #tpu.memory_space<vmem>>, vector<16x32xf32>,
    %c0_91 = arith.constant 0 : index
    %c0_92 = arith.constant 0 : index
    %121 = vector.load %arg11[%c0_91, %c0_92] : memref<16x32xf32, #tpu.memory_space<vmem>>, vector<16x32xf32>
    %c0_93 = arith.constant 0 : index
    %c0_94 = arith.constant 0 : index
    %122 = vector.load %arg8[%c0_93, %c0_94] : memref<1x32xf32, #tpu.memory_space<vmem>>, vector<1x32xf32>
    %123 = vector.broadcast %122 : vector<1x32xf32> to vector<16x32xf32>
    %124 = arith.addf %121, %123 : vector<16x32xf32>
    %c0_95 = arith.constant 0 : index
    %c0_96 = arith.constant 0 : index
    %c0_97 = arith.constant 0 : index
    %125 = vector.load %arg9[%c0_95, %c0_96, %c0_97] : memref<1x16x32xf32, #tpu.memory_space<vmem>>, vector<1x16x32xf32>
    %126 = vector.shape_cast %125 : vector<1x16x32xf32> to vector<16x32xf32>
    %127 = vector.shape_cast %124 : vector<16x32xf32> to vector<1x16x32xf32>
    tpu.vector_store %arg9[%c0_95, %c0_96, %c0_97], %127 {strides = array<i32>} : memref<1x16x32xf32, #tpu.memory_space<vmem>>, vector<1x16x32xf32>,
    return
  }
  func.func @transform_0(%arg0: i32, %arg1: i32) -> (i32, i32, i32) {
    %c0_i32 = arith.constant 0 : i32
    %c0_i32_0 = arith.constant 0 : i32
    return %arg0, %arg1, %c0_i32 : i32, i32, i32
  }
  func.func @transform_1(%arg0: i32, %arg1: i32) -> (i32, i32, i32, i32) {
    %c0_i32 = arith.constant 0 : i32
    %c0_i32_0 = arith.constant 0 : i32
    %c0_i32_1 = arith.constant 0 : i32
    %c0_i32_2 = arith.constant 0 : i32
    return %arg0, %c0_i32, %c0_i32_0, %c0_i32_1 : i32, i32, i32, i32
  }
  func.func @transform_2(%arg0: i32, %arg1: i32) -> (i32, i32, i32, i32) {
    %c0_i32 = arith.constant 0 : i32
    %c0_i32_0 = arith.constant 0 : i32
    %c0_i32_1 = arith.constant 0 : i32
    %c0_i32_2 = arith.constant 0 : i32
    return %arg0, %c0_i32, %c0_i32_0, %c0_i32_1 : i32, i32, i32, i32
  }
  func.func @transform_3(%arg0: i32, %arg1: i32) -> (i32, i32) {
    %c0_i32 = arith.constant 0 : i32
    %c0_i32_0 = arith.constant 0 : i32
    %c0_i32_1 = arith.constant 0 : i32
    return %c0_i32, %c0_i32_0 : i32, i32
  }
  func.func @transform_4(%arg0: i32, %arg1: i32) -> (i32, i32) {
    %c0_i32 = arith.constant 0 : i32
    %c0_i32_0 = arith.constant 0 : i32
    %c0_i32_1 = arith.constant 0 : i32
    return %c0_i32, %c0_i32_0 : i32, i32
  }
  func.func @transform_5(%arg0: i32, %arg1: i32) -> (i32, i32) {
    %c0_i32 = arith.constant 0 : i32
    %c0_i32_0 = arith.constant 0 : i32
    %c0_i32_1 = arith.constant 0 : i32
    return %c0_i32, %c0_i32_0 : i32, i32
  }
  func.func @transform_6(%arg0: i32, %arg1: i32) -> (i32, i32) {
    %c0_i32 = arith.constant 0 : i32
    %c0_i32_0 = arith.constant 0 : i32
    %c0_i32_1 = arith.constant 0 : i32
    return %c0_i32, %c0_i32_0 : i32, i32
  }
  func.func @transform_7(%arg0: i32, %arg1: i32) -> (i32, i32, i32) {
    %c0_i32 = arith.constant 0 : i32
    %c0_i32_0 = arith.constant 0 : i32
    return %arg0, %arg1, %c0_i32 : i32, i32, i32
  }
}

</mosaic_0001>

<bundles_post_ra>
// kernel: tpu_custom_call.1
= control target key start
LH: loop header
LB: loop body
LE: loop exit
PB: predicated region body
PF: predicated region fallthrough
CT: control target
= control target key end

     0   :  { %12 = vsyncpa [#allocation5], 0  ;;  %s2362_s0 = inlined_call_operand.vmem [shape: bf16[2,16,32], index: 0, kind: input, shape index: {}]   ;;  %s2363_s1 = inlined_call_operand.vmem [shape: bf16[2,4,8,128], index: 1, kind: input, shape index: {}]   ;;  %s2364_s2 = inlined_call_operand.vmem [shape: bf16[2,4,128,8], index: 2, kind: input, shape index: {}]   ;;  %s2365_s3 = inlined_call_operand.vmem [shape: bf16[32,32], index: 3, kind: input, shape index: {}]   ;;  %s2366_s4 = inlined_call_operand.vmem [shape: f32[1,32], index: 4, kind: input, shape index: {}]   ;;  %s2367_s5 = inlined_call_operand.vmem [shape: bf16[32,32], index: 5, kind: input, shape index: {}]   ;;  %s2368_s6 = inlined_call_operand.vmem [shape: f32[1,32], index: 6, kind: input, shape index: {}]   ;;  %s2369_s7 = inlined_call_operand.hbm [shape: f32[2,16,32], index: 7, kind: output, shape index: {}]  }
   0x1   :  { %14 = vsyncpa [#allocation5 + $0x1], 0  ;;  %s2061_s24 = smov 0   ;;  %s2063_s25 = smov 0  }
   0x2   :  { %s2065_s26 = smov 0   ;;  %s2067_s27 = smov 0  }
   0x3   :  { %s2069_s28 = smov 0   ;;  %s2071_s29 = smov 0  }
   0x4 LB: > { %s1493_s30 = sadd.s32 4294967295, %s2010_s29   ;;  %s1494_s8 = sadd.s32 4294967294, %s2010_s29   ;;  %s2010_s29 = sphi %s2071_s29, %s20_s29   ;;  %s2006_s28 = sphi %s2069_s28, %s2376_s28   ;;  %s2002_s27 = sphi %s2067_s27, %s2375_s27   ;;  %s1998_s26 = sphi %s2065_s26, %s2374_s26   ;;  %s1994_s25 = sphi %s2063_s25, %s2373_s25   ;;  %s1990_s24 = sphi %s2061_s24, %s2372_s24  }
   0x5   : > { %s32_s9 = sadd.s32 1, %s2006_s28  ;;  %s205_s10 = sadd.s32 1, %s1998_s26 }
   0x6   : > { %p34_p0 = scmp.ge.s32.totalorder %s32_s9, 2  ;;  %p215_p1 = scmp.ne.s32.totalorder %s1998_s26, %s1994_s25 }
   0x7   : > { %p216_p2 = scmp.eq.s32.totalorder %s1493_s30, 1  ;;  %p221_p3 = scmp.ne.s32.totalorder %s1994_s25, %s1990_s24 }
   0x8   : > { %s2378_s9 = smov (%p34_p0, %s32_s9), 0  ;;  %p222_p5 = scmp.eq.s32.totalorder %s1494_s8, 1 }
   0x9   : > { %p2101_p4 = por %p216_p2, %p215_p1  ;;  %s200_s12 = ssub.s32 %s2006_s28, %s2378_s9 }
   0xa   : > { %p1497_p6 = scmp.ge.s32.totalorder %s2010_s29, 1  ;;  %p203_p7 = scmp.eq.s32.totalorder %s200_s12, 0 }
   0xb   : > { %p2108_p8 = por %p222_p5, %p221_p3  ;;  %p281_p9 = scmp.lt.s32.totalorder %s2010_s29, 3 }
   0xc   : > { %s2114_s14 = scalar_select %p203_p7, %s1998_s26, %s205_s10  }
   0xd   : > { %p282_p10 = pnand %p1497_p6, %p281_p9 }
   0xe   : > { %v1865_v0 = vld [vmem:[%s2365_s3] sm:$0xff] (!%p282_p10)   ;;  %v2012_v1 = vmov (!%p282_p10), 0.0   ;;  %v1866_v2 = vld [vmem:[%s2365_s3 + $0x8] sm:$0xff] (!%p282_p10)   ;;  %vm2013_vm0 = vmmov (!%p282_p10), 0   ;;  %p328_p11 = scmp.lt.s32.totalorder (!%p282_p10), %s2002_s27, 1  ;;  %vm379_vm1 = vcmask (!%p282_p10), 261120   ;;  %v428_v18 = vlaneseq (!%p282_p10) }
   0xf   : > { %285 = sbr.rel (%p282_p10) target bundleno = 2408 (0x968), region = 48  ;;  %1666 = vmatprep.subr.bf16.mxu0 (!%p282_p10), %v2012_v1  ;;  %1674 = vmatprep.subr.bf16.mxu1 (!%p282_p10), %v2012_v1  ;;  %426 = vst.msk [vmem:[#allocation3] sm:$0xff] (!%p282_p10), %vm379_vm1, %v2012_v1  ;;  %427 = vst.msk [vmem:[#allocation3 + $0x8] sm:$0xff] (!%p282_p10), %vm379_vm1, %v2012_v1  ;;  %vm454_vm2 = vcmask (!%p282_p10), 1043456   ;;  %v1505_v8 = vld [vmem:[%s2366_s4] ss:$0 sm:$0xff] (!%p282_p10) }
  0x10   : > { %1667 = vmatpush3.bf16.msra.mxu0 (!%p282_p10), %v1865_v0  ;;  %1670 = vmatprep.mubr.msk.bf16.mxu0 (!%p282_p10), %vm2013_vm0, %v2012_v1  ;;  %vm450_vm3 = vcmask (!%p282_p10), 64512   ;;  %v429_v19 = vand.u32 (!%p282_p10), 127, %v428_v18  ;;  %v2015_v22 = vmov (!%p282_p10), -1e+30   ;;  %v610_v59 = vld [vmem:[%s2367_s5] sm:$0xf] (!%p282_p10) }
  0x11   : > { %1668 = vmatprep.subr.bf16.mxu0 (!%p282_p10), %v2012_v1  ;;  %1676 = vmatprep.mubr.msk.bf16.mxu1 (!%p282_p10), %vm2013_vm0, %v2012_v1  ;;  %v615_v60 = vsel (!%p282_p10), %vm454_vm2, %v610_v59, 0  ;;  %s2017_s17 = smov (!%p282_p10), 104   ;;  %s1610_s23 = sshll.u32 (!%p282_p10), %s2002_s27, 8 }
  0x12   : > { %vm430_vm4 = vcmp.lt.s32.totalorder (!%p282_p10), %v429_v19, 8  ;;  %s2310_s16 = scalar_lea.hbm (!%p282_p10), %s2369_s7, %s1610_s23 }
  0x13   : > { %v2175_v23 = vsel (!%p282_p10), %vm430_vm4, 0.0, %v2015_v22 }
  0x14   : > { %1669 = vmatpush3.bf16.msra.mxu0 (!%p282_p10), %v1866_v2 }
  0x15   : > { %1706 = vmatprep.subr.bf16.mxu0 (!%p282_p10), %v2012_v1 }
  0x16   : > { %s329_s19 = scalar_select %p328_p11, %s2002_s27, 1 }
  0x18   : > { %s1607_s20 = sshll.u32 %s329_s19, 3  ;;  %s1609_s21 = sshll.u32 %s329_s19, 8 }
  0x19   : > { %s335_s30 = scalar_lea.vmem %s2362_s0, %s1607_s20  ;;  %s2142_s12 = scalar_lea.vmem %s2364_s2, %s1609_s21 }
  0x1a   : > { %v1867_v3 = vld [vmem:[%s335_s30] sm:$0xff]   ;;  %s1608_s15 = sshll.u32 %s329_s19, 4  ;;  %s2014_s21 = smov 120   ;;  %v1869_v21 = vld [vmem:[%s2142_s12 + $0x8] sm:$0xff]   ;;  %v1870_v25 = vld [vmem:[%s2142_s12 + $0x10] sm:$0xff]  }
  0x1b   : > { %1671 = vmatmul.mubr.msk.bf16.vlgmr.msra.gmra.mrb[0].mxu0 %vm379_vm1, %v1867_v3  ;;  %s2150_s18 = scalar_lea.vmem %s2363_s1, %s1608_s15  ;;  %v1868_v20 = vld [vmem:[%s2142_s12] sm:$0xff]   ;;  %v1871_v31 = vld [vmem:[%s2142_s12 + $0x18] sm:$0xff]   ;;  %v1873_v33 = vld [vmem:[%s2142_s12 + $0x28] sm:$0xff]   ;;  %s2016_s30 = smov 112  }
  0x1c   : > { %1708 = vmatprep.mubr.msk.bf16.mxu0 %vm2013_vm0, %v2012_v1  ;;  %v433_v4 = vld [vmem:[%s2150_s18] sm:$0xf]  ;;  %v1520_v6 = vld [vmem:[%s2150_s18 + $0x4] sm:$0xf]  ;;  %v1874_v34 = vld [vmem:[%s2142_s12 + $0x30] sm:$0xff]  }
  0x1d   : > { %v456_v5 = vsel %vm454_vm2, %v433_v4, 0  ;;  %v689_v7 = vsel %vm454_vm2, %v1520_v6, 0  ;;  %v1872_v32 = vld [vmem:[%s2142_s12 + $0x20] sm:$0xff]   ;;  %v1875_v35 = vld [vmem:[%s2142_s12 + $0x38] sm:$0xff]   ;;  %v1877_v37 = vld [vmem:[%s2142_s12 + $0x48] sm:$0xff]  }
  0x1e   : > { %1675 = vmatpush3.bf16.msra.mxu1 %v456_v5  ;;  %1707 = vmatpush3.bf16.msra.mxu0 %v689_v7  ;;  %v1876_v36 = vld [vmem:[%s2142_s12 + $0x40] sm:$0xff]   ;;  %v1878_v38 = vld [vmem:[%s2142_s12 + $0x50] sm:$0xff]   ;;  %v1879_v45 = vld [vmem:[%s2142_s12 + $0x58] sm:$0xff]  }
  0x1f   : > { %1680 = vmatprep.subr.bf16.mxu1 %v2012_v1  ;;  %1712 = vmatprep.subr.bf16.mxu0 %v2012_v1  ;;  %v1880_v46 = vld [vmem:[%s2142_s12 + $0x60] sm:$0xff]   ;;  %v1881_v47 = vld [vmem:[%s2142_s12 + $0x68] sm:$0xff]   ;;  %v1882_v48 = vld [vmem:[%s2142_s12 + $0x70] sm:$0xff]  }
  0x20   : > { %v1883_v54 = vld [vmem:[%s2142_s12 + $0x78] sm:$0xff]  }
  0xee   : > { %v417_v9 = vpop.f32.mrb[0].mxu0 }
  0xef   : > { %v1672_v10 = vpop.f32.mrb[1].mxu0  ;;  %v418_v12 = vadd.f32 %v1505_v8, %v417_v9 }
  0xf0   : > { %v420_v11 = vpop.f32.mrb[2].mxu0 }
  0xf1   : > { %v421_v13 = vadd.f32 %v1505_v8, %v420_v11  ;;  %v1673_v14 = vpop.f32.mrb[3].mxu0 }
  0xf2   : > { %v843_v14 = vld [vmem:[%s2367_s5 + $0x4] sm:$0xf] }
  0xf3   : > { %v424_v15 = vpack.c.bf16 %v421_v13, %v418_v12 }
  0xf5   : > { %425 = vst.msk [vmem:[#allocation2] sm:$0xff] %vm379_vm1, %v424_v15 }
  0xfc   : > { %v2162_v16 = vld [vmem:[#allocation2] sm:$0xff] }
  0xfd   : > { %683 = vrot.lane.b32.xlu0 %v2162_v16, %s2014_s21  ;;  %1677 = vmatmul.mubr.msk.bf16.vlgmr.msra.gmra.mrb[0].mxu1 %vm450_vm3, %v2162_v16 }
  0xfe   : > { %1696 = vmatprep.mubr.msk.bf16.mxu1 %vm2013_vm0, %v2012_v1  ;;  %1681 = vmatpush3.bf16.msra.mxu1 %v1868_v20  ;;  %v848_v20 = vsel %vm454_vm2, %v843_v14, 0 }
  0xff   : > { %1682 = vmatprep.subr.bf16.mxu1 %v2012_v1 }
 0x102   : > { %1683 = vmatpush3.bf16.msra.mxu1 %v1869_v21 }
 0x103   : > { %1684 = vmatprep.subr.bf16.mxu1 %v2012_v1 }
 0x106   : > { %1685 = vmatpush3.bf16.msra.mxu1 %v1870_v25 }
 0x107   : > { %1686 = vmatprep.subr.bf16.mxu1 %v2012_v1 }
 0x10a   : > { %1687 = vmatpush3.bf16.msra.mxu1 %v1871_v31 }
 0x10b   : > { %1688 = vmatprep.subr.bf16.mxu1 %v2012_v1 }
 0x10e   : > { %1689 = vmatpush3.bf16.msra.mxu1 %v1872_v32 }
 0x10f   : > { %1690 = vmatprep.subr.bf16.mxu1 %v2012_v1 }
 0x112   : > { %1691 = vmatpush3.bf16.msra.mxu1 %v1873_v33 }
 0x113   : > { %1692 = vmatprep.subr.bf16.mxu1 %v2012_v1 }
 0x116   : > { %1693 = vmatpush3.bf16.msra.mxu1 %v1874_v34 }
 0x117   : > { %1694 = vmatprep.subr.bf16.mxu1 %v2012_v1 }
 0x11a   : > { %1695 = vmatpush3.bf16.msra.mxu1 %v1875_v35 }
 0x11b   : > { %1700 = vmatprep.subr.bf16.mxu1 %v2012_v1 }
 0x16f   : > { %v684_v17 = vpop.permute.xlu0 %683 }
 0x170   : > { %1709 = vmatmul.mubr.msk.bf16.vlgmr.msra.gmra.mrb[4].mxu0 %vm450_vm3, %v684_v17 }
 0x171   : > { %1728 = vmatprep.mubr.msk.bf16.mxu0 %vm2013_vm0, %v2012_v1  ;;  %1713 = vmatpush3.bf16.msra.mxu0 %v1876_v36  ;;  %v607_v36 = vld [vmem:[#allocation3] sm:$0xff] }
 0x172   : > { %1714 = vmatprep.subr.bf16.mxu0 %v2012_v1 }
 0x175   : > { %1715 = vmatpush3.bf16.msra.mxu0 %v1877_v37 }
 0x176   : > { %1716 = vmatprep.subr.bf16.mxu0 %v2012_v1 }
 0x179   : > { %1717 = vmatpush3.bf16.msra.mxu0 %v1878_v38  ;;  %v608_v38 = vld [vmem:[#allocation3 + $0x8] sm:$0xff] }
 0x17a   : > { %1718 = vmatprep.subr.bf16.mxu0 %v2012_v1 }
 0x17d   : > { %1719 = vmatpush3.bf16.msra.mxu0 %v1879_v45  ;;  %v1885_v45 = vld [vmem:[%s2142_s12 + $0x88] sm:$0xff]  }
 0x17e   : > { %1720 = vmatprep.subr.bf16.mxu0 %v2012_v1 }
 0x181   : > { %1721 = vmatpush3.bf16.msra.mxu0 %v1880_v46  ;;  %v1886_v46 = vld [vmem:[%s2142_s12 + $0x90] sm:$0xff]  }
 0x182   : > { %1722 = vmatprep.subr.bf16.mxu0 %v2012_v1 }
 0x185   : > { %1723 = vmatpush3.bf16.msra.mxu0 %v1881_v47 }
 0x186   : > { %1724 = vmatprep.subr.bf16.mxu0 %v2012_v1 }
 0x189   : > { %1725 = vmatpush3.bf16.msra.mxu0 %v1882_v48 }
 0x18a   : > { %1726 = vmatprep.subr.bf16.mxu0 %v2012_v1 }
 0x18d   : > { %1727 = vmatpush3.bf16.msra.mxu0 %v1883_v54 }
 0x18e   : > { %1764 = vmatprep.subr.bf16.mxu0 %v2012_v1 }
 0x1d0   : > { %v492_v24 = vpop.f32.mrb[0].mxu1 }
 0x1d1   : > { %v493_v26 = vadd.f32 %v492_v24, %v2175_v23  ;;  %v1678_v27 = vpop.f32.mrb[1].mxu1 }
 0x1d2   : > { %v495_v28 = vpop.f32.mrb[2].mxu1 }
 0x1d3   : > { %v496_v29 = vadd.f32 %v495_v28, %v2175_v23  ;;  %499 = vmax.xlane.f32.xlu0 %v493_v26  ;;  %v1679_v30 = vpop.f32.mrb[3].mxu1 }
 0x1d5   : > { %501 = vmax.xlane.f32.xlu1 %v496_v29 }
 0x243   : > { %v725_v39 = vpop.f32.mrb[4].mxu0 }
 0x244   : > { %v726_v40 = vadd.f32 %v725_v39, %v2175_v23  ;;  %v1710_v41 = vpop.f32.mrb[5].mxu0 }
 0x245   : > { %v728_v42 = vpop.f32.mrb[6].mxu0 }
 0x246   : > { %732 = vmax.xlane.f32.xlu1 %v726_v40  ;;  %v1711_v43 = vpop.f32.mrb[7].mxu0  ;;  %v729_v44 = vadd.f32 %v728_v42, %v2175_v23 }
 0x24a   : > { %734 = vmax.xlane.f32.xlu1 %v729_v44 }
 0x260   : > { %v500_v49 = vpop.xlane.xlu0 %499 }
 0x261   : > { %v503_v50 = vsub.f32 %v493_v26, %v500_v49 }
 0x262   : > { %v502_v51 = vpop.xlane.xlu1 %501 }
 0x263   : > { %v505_v52 = vmul.f32 1.442695, %v503_v50  ;;  %v504_v53 = vsub.f32 %v496_v29, %v502_v51  ;;  %v1547_v29 = vld [vmem:[%s2150_s18 + $0x8] sm:$0xf] }
 0x264   : > { %v922_v34 = vsel %vm454_vm2, %v1547_v29, 0  ;;  %v1892_v29 = vld [vmem:[%s2142_s12 + $0xc0] sm:$0xff]  }
 0x265   : > { %1900 = vpow2.f32 %v505_v52  ;;  %v507_v55 = vmul.f32 1.442695, %v504_v53 }
 0x267   : > { %1902 = vpow2.f32 %v507_v55 }
 0x26f   : > { %v1901_v56 = vpop.eup %1900 }
 0x270   : > { %509 = vadd.xlane.f32.xlu1 %v1901_v56 }
 0x271   : > { %v1903_v57 = vpop.eup %1902 }
 0x272   : > { %v513_v58 = vpack.c.bf16 %v1903_v57, %v1901_v56 }
 0x274   : > { %1697 = vmatmul.mubr.bf16.vlgmr.msra.gmra.mrb[4].mxu1 %v513_v58  ;;  %511 = vadd.xlane.f32.xlu1 %v1903_v57 }
 0x275   : > { %1702 = vmatprep.mubr.msk.bf16.mxu1 %vm2013_vm0, %v2012_v1  ;;  %1701 = vmatpush3.bf16.msra.mxu1 %v615_v60 }
 0x276   : > { %1732 = vmatprep.subr.bf16.mxu1 %v2012_v1 }
 0x2d3   : > { %v733_v61 = vpop.xlane.xlu1 %732 }
 0x2d4   : > { %v736_v62 = vsub.f32 %v726_v40, %v733_v61  ;;  %v1887_v61 = vld [vmem:[%s2142_s12 + $0x98] sm:$0xff]  }
 0x2d6   : > { %v738_v63 = vmul.f32 1.442695, %v736_v62  ;;  %v1888_v62 = vld [vmem:[%s2142_s12 + $0xa0] sm:$0xff]  }
 0x2d7   : > { %v735_v0 = vpop.xlane.xlu1 %734 }
 0x2d8   : > { %1904 = vpow2.f32 %v738_v63  ;;  %v737_v2 = vsub.f32 %v729_v44, %v735_v0  ;;  %v1884_v44 = vld [vmem:[%s2142_s12 + $0x80] sm:$0xff]   ;;  %v1889_v63 = vld [vmem:[%s2142_s12 + $0xa8] sm:$0xff]   ;;  %v1890_v0 = vld [vmem:[%s2142_s12 + $0xb0] sm:$0xff]  }
 0x2da   : > { %v740_v3 = vmul.f32 1.442695, %v737_v2  ;;  %v1891_v2 = vld [vmem:[%s2142_s12 + $0xb8] sm:$0xff]  }
 0x2dc   : > { %1906 = vpow2.f32 %v740_v3 }
 0x2e2   : > { %v1905_v4 = vpop.eup %1904 }
 0x2e3   : > { %742 = vadd.xlane.f32.xlu1 %v1905_v4 }
 0x2e6   : > { %v1907_v5 = vpop.eup %1906 }
 0x2e7   : > { %744 = vadd.xlane.f32.xlu1 %v1907_v5  ;;  %v746_v6 = vpack.c.bf16 %v1907_v5, %v1905_v4 }
 0x2e9   : > { %1729 = vmatmul.mubr.bf16.vlgmr.msra.gmra.mrb[8].mxu0 %v746_v6 }
 0x2ea   : > { %1766 = vmatprep.mubr.msk.bf16.mxu0 %vm2013_vm0, %v2012_v1 }
 0x2f8   : > { %916 = vrot.lane.b32.xlu1 %v2162_v16, %s2016_s30 }
 0x2fd   : > { %v510_v7 = vpop.xlane.xlu1 %509 }
 0x2fe   : > { %1908 = vrcp.f32 %v510_v7 }
 0x301   : > { %v512_v8 = vpop.xlane.xlu1 %511 }
 0x302   : > { %1910 = vrcp.f32 %v512_v8 }
 0x308   : > { %v1909_v10 = vpop.eup %1908 }
 0x30c   : > { %v1911_v12 = vpop.eup %1910 }
 0x347   : > { %v596_v9 = vpop.f32.mrb[4].mxu1 }
 0x348   : > { %v1698_v11 = vpop.f32.mrb[5].mxu1  ;;  %v605_v15 = vmul.f32 %v1909_v10, %v596_v9 }
 0x349   : > { %v599_v13 = vpop.f32.mrb[6].mxu1 }
 0x34a   : > { %v606_v17 = vmul.f32 %v1911_v12, %v599_v13  ;;  %v1699_v18 = vpop.f32.mrb[7].mxu1  ;;  %v1076_v12 = vld [vmem:[%s2367_s5 + $0x8] sm:$0xf] }
 0x34b   : > { %v1081_v13 = vsel %vm454_vm2, %v1076_v12, 0 }
 0x34c   : > { %v609_v19 = vpack.c.bf16 %v606_v17, %v605_v15  ;;  %1765 = vmatpush3.bf16.msra.mxu0 %v1081_v13 }
 0x34d   : > { %1770 = vmatprep.subr.bf16.mxu0 %v2012_v1 }
 0x34e   : > { %1703 = vmatmul.mubr.msk.bf16.vlgmr.msra.gmra.mrb[8].mxu1 %vm450_vm3, %v609_v19 }
 0x34f   : > { %1733 = vmatpush3.bf16.msra.mxu1 %v848_v20  ;;  %1734 = vmatprep.mubr.msk.bf16.mxu1 %vm2013_vm0, %v2012_v1 }
 0x350   : > { %1738 = vmatprep.subr.bf16.mxu1 %v2012_v1 }
 0x370   : > { %v743_v21 = vpop.xlane.xlu1 %742 }
 0x371   : > { %1912 = vrcp.f32 %v743_v21 }
 0x374   : > { %v745_v22 = vpop.xlane.xlu1 %744 }
 0x375   : > { %1914 = vrcp.f32 %v745_v22  ;;  %v1574_v22 = vld [vmem:[%s2150_s18 + $0xc] sm:$0xf]  ;;  %s2018_s18 = smov [#allocation4]  }
 0x376   : > { %s1936_s19 = sshll.u32 %s2018_s18, 4  ;;  %s1937_s19 = int_to_ptr.vmem [resolvable:$false] %s1936_s19 }
 0x378   : > { %v917_v35 = vpop.permute.xlu1 %916 }
 0x37b   : > { %v1913_v25 = vpop.eup %1912 }
 0x37f   : > { %v1915_v27 = vpop.eup %1914 }
 0x3bc   : > { %v829_v24 = vpop.f32.mrb[8].mxu0 }
 0x3bd   : > { %v1730_v26 = vpop.f32.mrb[9].mxu0  ;;  %v838_v30 = vmul.f32 %v1913_v25, %v829_v24 }
 0x3be   : > { %v832_v28 = vpop.f32.mrb[10].mxu0 }
 0x3bf   : > { %v839_v31 = vmul.f32 %v1915_v27, %v832_v28  ;;  %v1731_v32 = vpop.f32.mrb[11].mxu0  ;;  %v1155_v28 = vsel %vm454_vm2, %v1574_v22, 0 }
 0x3c1   : > { %v842_v33 = vpack.c.bf16 %v839_v31, %v838_v30  ;;  %v1893_v30 = vld [vmem:[%s2142_s12 + $0xc8] sm:$0xff]   ;;  %v1894_v31 = vld [vmem:[%s2142_s12 + $0xd0] sm:$0xff]  }
 0x3c3   : > { %1735 = vmatmul.mubr.msk.bf16.vlgmr.msra.gmra.mrb[12].mxu1 %vm450_vm3, %v842_v33 }
 0x3c4   : > { %1739 = vmatpush3.bf16.msra.mxu1 %v922_v34  ;;  %1740 = vmatprep.mubr.msk.bf16.mxu1 %vm2013_vm0, %v2012_v1 }
 0x3c5   : > { %1744 = vmatprep.subr.bf16.mxu1 %v2012_v1 }
 0x3cb   : > { %1741 = vmatmul.mubr.msk.bf16.vlgmr.msra.gmra.mrb[16].mxu1 %vm450_vm3, %v917_v35 }
 0x3cc   : > { %1760 = vmatprep.mubr.msk.bf16.mxu1 %vm2013_vm0, %v2012_v1  ;;  %1745 = vmatpush3.bf16.msra.mxu1 %v1884_v44 }
 0x3cd   : > { %1746 = vmatprep.subr.bf16.mxu1 %v2012_v1 }
 0x3d0   : > { %1747 = vmatpush3.bf16.msra.mxu1 %v1885_v45 }
 0x3d1   : > { %1748 = vmatprep.subr.bf16.mxu1 %v2012_v1 }
 0x3d4   : > { %1749 = vmatpush3.bf16.msra.mxu1 %v1886_v46  ;;  %v1895_v46 = vld [vmem:[%s2142_s12 + $0xd8] sm:$0xff]  }
 0x3d5   : > { %1750 = vmatprep.subr.bf16.mxu1 %v2012_v1 }
 0x3d8   : > { %1751 = vmatpush3.bf16.msra.mxu1 %v1887_v61 }
 0x3d9   : > { %1752 = vmatprep.subr.bf16.mxu1 %v2012_v1 }
 0x3dc   : > { %1753 = vmatpush3.bf16.msra.mxu1 %v1888_v62 }
 0x3dd   : > { %1754 = vmatprep.subr.bf16.mxu1 %v2012_v1 }
 0x3e0   : > { %1755 = vmatpush3.bf16.msra.mxu1 %v1889_v63 }
 0x3e1   : > { %1756 = vmatprep.subr.bf16.mxu1 %v2012_v1 }
 0x3e4   : > { %1757 = vmatpush3.bf16.msra.mxu1 %v1890_v0 }
 0x3e5   : > { %1758 = vmatprep.subr.bf16.mxu1 %v2012_v1 }
 0x3e8   : > { %1759 = vmatpush3.bf16.msra.mxu1 %v1891_v2 }
 0x3e9   : > { %1796 = vmatprep.subr.bf16.mxu1 %v2012_v1 }
 0x421   : > { %v651_v37 = vpop.f32.mrb[8].mxu1 }
 0x422   : > { %v658_v39 = vadd.f32 %v651_v37, %v607_v36  ;;  %v1704_v40 = vpop.f32.mrb[9].mxu1 }
 0x423   : > { %v654_v41 = vpop.f32.mrb[10].mxu1 }
 0x424   : > { %660 = vst.msk [vmem:[#allocation3] sm:$0xff] %vm379_vm1, %v658_v39  ;;  %v659_v42 = vadd.f32 %v654_v41, %v608_v38  ;;  %v1705_v43 = vpop.f32.mrb[11].mxu1 }
 0x426   : > { %661 = vst.msk [vmem:[#allocation3 + $0x8] sm:$0xff] %vm379_vm1, %v659_v42 }
 0x42b   : > { %v840_v47 = vld [vmem:[#allocation3] sm:$0xff] }
 0x42d   : > { %v841_v51 = vld [vmem:[#allocation3 + $0x8] sm:$0xff] }
 0x496   : > { %v884_v48 = vpop.f32.mrb[12].mxu1 }
 0x497   : > { %v891_v49 = vadd.f32 %v884_v48, %v840_v47  ;;  %v1736_v50 = vpop.f32.mrb[13].mxu1  ;;  %v1896_v47 = vld [vmem:[%s2142_s12 + $0xe0] sm:$0xff]   ;;  %v1897_v48 = vld [vmem:[%s2142_s12 + $0xe8] sm:$0xff]  }
 0x498   : > { %v887_v52 = vpop.f32.mrb[14].mxu1 }
 0x499   : > { %893 = vst.msk [vmem:[#allocation3] sm:$0xff] %vm379_vm1, %v891_v49  ;;  %v892_v53 = vadd.f32 %v887_v52, %v841_v51  ;;  %v1737_v54 = vpop.f32.mrb[15].mxu1  ;;  %v1898_v49 = vld [vmem:[%s2142_s12 + $0xf0] sm:$0xff]  }
 0x49b   : > { %894 = vst.msk [vmem:[#allocation3 + $0x8] sm:$0xff] %vm379_vm1, %v892_v53 }
 0x49e   : > { %v958_v55 = vpop.f32.mrb[16].mxu1 }
 0x49f   : > { %v959_v56 = vadd.f32 %v958_v55, %v2175_v23  ;;  %v1742_v57 = vpop.f32.mrb[17].mxu1 }
 0x4a0   : > { %v961_v58 = vpop.f32.mrb[18].mxu1  ;;  %v1073_v32 = vld [vmem:[#allocation3] sm:$0xff] }
 0x4a1   : > { %965 = vmax.xlane.f32.xlu0 %v959_v56  ;;  %v1743_v59 = vpop.f32.mrb[19].mxu1  ;;  %v962_v60 = vadd.f32 %v961_v58, %v2175_v23 }
 0x4a2   : > { %v1074_v36 = vld [vmem:[#allocation3 + $0x8] sm:$0xff] }
 0x4a5   : > { %967 = vmax.xlane.f32.xlu0 %v962_v60 }
 0x52e   : > { %v966_v3 = vpop.xlane.xlu0 %965 }
 0x52f   : > { %v969_v4 = vsub.f32 %v959_v56, %v966_v3 }
 0x531   : > { %v971_v5 = vmul.f32 1.442695, %v969_v4 }
 0x532   : > { %v968_v6 = vpop.xlane.xlu0 %967 }
 0x533   : > { %1916 = vpow2.f32 %v971_v5  ;;  %v970_v7 = vsub.f32 %v962_v60, %v968_v6 }
 0x535   : > { %v973_v8 = vmul.f32 1.442695, %v970_v7 }
 0x537   : > { %1918 = vpow2.f32 %v973_v8 }
 0x53d   : > { %v1917_v9 = vpop.eup %1916 }
 0x53e   : > { %975 = vadd.xlane.f32.xlu0 %v1917_v9 }
 0x541   : > { %v1919_v10 = vpop.eup %1918 }
 0x542   : > { %977 = vadd.xlane.f32.xlu1 %v1919_v10  ;;  %v979_v11 = vpack.c.bf16 %v1919_v10, %v1917_v9 }
 0x544   : > { %1761 = vmatmul.mubr.bf16.vlgmr.msra.gmra.mrb[20].mxu1 %v979_v11 }
 0x545   : > { %1798 = vmatprep.mubr.msk.bf16.mxu1 %vm2013_vm0, %v2012_v1 }
 0x554   : > { %1149 = vrot.lane.b32.xlu0 %v2162_v16, %s2017_s17 }
 0x5cb   : > { %v976_v14 = vpop.xlane.xlu0 %975 }
 0x5cc   : > { %1920 = vrcp.f32 %v976_v14 }
 0x5cf   : > { %v978_v15 = vpop.xlane.xlu1 %977  ;;  %v1150_v16 = vpop.permute.xlu0 %1149 }
 0x5d0   : > { %1922 = vrcp.f32 %v978_v15 }
 0x5d6   : > { %v1921_v18 = vpop.eup %1920 }
 0x5da   : > { %v1923_v20 = vpop.eup %1922 }
 0x617   : > { %v1062_v17 = vpop.f32.mrb[20].mxu1 }
 0x618   : > { %v1762_v19 = vpop.f32.mrb[21].mxu1  ;;  %v1071_v24 = vmul.f32 %v1921_v18, %v1062_v17  ;;  %v1601_v17 = vld [vmem:[%s2368_s6] ss:$0 sm:$0xff] }
 0x619   : > { %v1065_v21 = vpop.f32.mrb[22].mxu1 }
 0x61a   : > { %v1072_v25 = vmul.f32 %v1923_v20, %v1065_v21  ;;  %v1763_v26 = vpop.f32.mrb[23].mxu1 }
 0x61c   : > { %v1075_v27 = vpack.c.bf16 %v1072_v25, %v1071_v24 }
 0x61e   : > { %1767 = vmatmul.mubr.msk.bf16.vlgmr.msra.gmra.mrb[12].mxu0 %vm450_vm3, %v1075_v27 }
 0x61f   : > { %1771 = vmatpush3.bf16.msra.mxu0 %v1155_v28  ;;  %1772 = vmatprep.mubr.msk.bf16.mxu0 %vm2013_vm0, %v2012_v1 }
 0x620   : > { %1776 = vmatprep.subr.bf16.mxu0 %v2012_v1 }
 0x626   : > { %1773 = vmatmul.mubr.msk.bf16.vlgmr.msra.gmra.mrb[16].mxu0 %vm450_vm3, %v1150_v16 }
 0x627   : > { %1792 = vmatprep.mubr.msk.bf16.mxu0 %vm2013_vm0, %v2012_v1  ;;  %1777 = vmatpush3.bf16.msra.mxu0 %v1892_v29 }
 0x628   : > { %1778 = vmatprep.subr.bf16.mxu0 %v2012_v1 }
 0x62b   : > { %1779 = vmatpush3.bf16.msra.mxu0 %v1893_v30 }
 0x62c   : > { %1780 = vmatprep.subr.bf16.mxu0 %v2012_v1 }
 0x62f   : > { %1781 = vmatpush3.bf16.msra.mxu0 %v1894_v31 }
 0x630   : > { %1782 = vmatprep.subr.bf16.mxu0 %v2012_v1 }
 0x633   : > { %1783 = vmatpush3.bf16.msra.mxu0 %v1895_v46 }
 0x634   : > { %1784 = vmatprep.subr.bf16.mxu0 %v2012_v1 }
 0x637   : > { %1785 = vmatpush3.bf16.msra.mxu0 %v1896_v47 }
 0x638   : > { %1786 = vmatprep.subr.bf16.mxu0 %v2012_v1 }
 0x63b   : > { %1787 = vmatpush3.bf16.msra.mxu0 %v1897_v48 }
 0x63c   : > { %1788 = vmatprep.subr.bf16.mxu0 %v2012_v1 }
 0x63f   : > { %1789 = vmatpush3.bf16.msra.mxu0 %v1898_v49 }
 0x640   : > { %1790 = vmatprep.subr.bf16.mxu0 %v2012_v1  ;;  %v1309_v1 = vld [vmem:[%s2367_s5 + $0xc] sm:$0xf] }
 0x641   : > { %v1314_v59 = vsel %vm454_vm2, %v1309_v1, 0 }
 0x642   : > { %1797 = vmatpush3.bf16.msra.mxu1 %v1314_v59 }
 0x6f1   : > { %v1117_v33 = vpop.f32.mrb[12].mxu0 }
 0x6f2   : > { %v1124_v34 = vadd.f32 %v1117_v33, %v1073_v32  ;;  %v1768_v35 = vpop.f32.mrb[13].mxu0 }
 0x6f3   : > { %v1120_v37 = vpop.f32.mrb[14].mxu0 }
 0x6f4   : > { %1126 = vst.msk [vmem:[#allocation3] sm:$0xff] %vm379_vm1, %v1124_v34  ;;  %v1125_v38 = vadd.f32 %v1120_v37, %v1074_v36  ;;  %v1769_v39 = vpop.f32.mrb[15].mxu0 }
 0x6f6   : > { %1127 = vst.msk [vmem:[#allocation3 + $0x8] sm:$0xff] %vm379_vm1, %v1125_v38 }
 0x6f9   : > { %v1191_v40 = vpop.f32.mrb[16].mxu0 }
 0x6fa   : > { %v1192_v41 = vadd.f32 %v1191_v40, %v2175_v23  ;;  %v1774_v42 = vpop.f32.mrb[17].mxu0 }
 0x6fb   : > { %v1194_v43 = vpop.f32.mrb[18].mxu0  ;;  %v1306_v8 = vld [vmem:[#allocation3] sm:$0xff] }
 0x6fc   : > { %v1195_v44 = vadd.f32 %v1194_v43, %v2175_v23  ;;  %1198 = vmax.xlane.f32.xlu0 %v1192_v41  ;;  %v1775_v45 = vpop.f32.mrb[19].mxu0  ;;  %v1899_v23 = vld [vmem:[%s2142_s12 + $0xf8] sm:$0xff]   ;;  %s324_s12 = sand.u32 1, %s1994_s25  }
 0x6fd   : > { %1791 = vmatpush3.bf16.msra.mxu0 %v1899_v23  ;;  %v1307_v12 = vld [vmem:[#allocation3 + $0x8] sm:$0xff]  ;;  %s1498_s20 = sshll.u32 %s324_s12, 4  ;;  %s2316_s27 = scalar_lea.sflag [#allocation5], %s324_s12 }
 0x6fe   : > { %1200 = vmax.xlane.f32.xlu1 %v1195_v44  ;;  %s326_s30 = scalar_lea.vmem [#allocation4], %s1498_s20  ;;  %s1938_s20 = scalar_lea.vmem %s1937_s19, 512 }
 0x6ff   : > { %s1390_s8 = sshll.u32 %s326_s30, 4  ;;  %s2312_s8 = int_to_ptr.vmem [resolvable:$true] %s1390_s8 }
 0x700   : > { %s1932_s17 = scalar_lea.vmem %s2312_s8, 256  ;;  %p1939_p1 = scmp.lt.s32.totalorder %s2312_s8, %s1937_s19 }
 0x701   : > { %p1933_p12 = scmp.ne.s32.totalorder %s2312_s8, %s1932_s17  ;;  %p1940_p2 = scmp.lt.s32.totalorder %s1938_s20, %s1932_s17 }
 0x703   : > { %p1934_p13 = pnand %p1933_p12, %p2101_p4  ;;  %p1941_p3 = por %p1940_p2, %p1939_p1 }
 0x705   : > { %p1935_p0 = pneg %p1934_p13 }
 0x707   : > { %p1942_p5 = pnand %p1941_p3, %p1935_p0 }
 0x789   : > { %v1199_v50 = vpop.xlane.xlu0 %1198 }
 0x78a   : > { %v1202_v51 = vsub.f32 %v1192_v41, %v1199_v50 }
 0x78b   : > { %v1201_v52 = vpop.xlane.xlu1 %1200 }
 0x78c   : > { %v1204_v53 = vmul.f32 1.442695, %v1202_v51  ;;  %v1203_v54 = vsub.f32 %v1195_v44, %v1201_v52 }
 0x78e   : > { %1924 = vpow2.f32 %v1204_v53  ;;  %v1206_v55 = vmul.f32 1.442695, %v1203_v54 }
 0x790   : > { %1926 = vpow2.f32 %v1206_v55 }
 0x798   : > { %v1925_v56 = vpop.eup %1924 }
 0x799   : > { %1208 = vadd.xlane.f32.xlu1 %v1925_v56 }
 0x79a   : > { %v1927_v57 = vpop.eup %1926 }
 0x79b   : > { %v1212_v58 = vpack.c.bf16 %v1927_v57, %v1925_v56 }
 0x79d   : > { %1210 = vadd.xlane.f32.xlu1 %v1927_v57  ;;  %1793 = vmatmul.mubr.bf16.vlgmr.msra.gmra.mrb[20].mxu0 %v1212_v58 }
 0x826   : > { %v1209_v60 = vpop.xlane.xlu1 %1208 }
 0x827   : > { %1928 = vrcp.f32 %v1209_v60 }
 0x82a   : > { %v1211_v61 = vpop.xlane.xlu1 %1210 }
 0x82b   : > { %1930 = vrcp.f32 %v1211_v61 }
 0x831   : > { %v1929_v63 = vpop.eup %1928 }
 0x835   : > { %v1931_v2 = vpop.eup %1930 }
 0x870   : > { %v1295_v62 = vpop.f32.mrb[20].mxu0 }
 0x871   : > { %v1794_v0 = vpop.f32.mrb[21].mxu0  ;;  %v1304_v4 = vmul.f32 %v1929_v63, %v1295_v62 }
 0x872   : > { %v1298_v3 = vpop.f32.mrb[22].mxu0 }
 0x873   : > { %v1305_v5 = vmul.f32 %v1931_v2, %v1298_v3  ;;  %v1795_v6 = vpop.f32.mrb[23].mxu0 }
 0x875   : > { %v1308_v7 = vpack.c.bf16 %v1305_v5, %v1304_v4 }
 0x877   : > { %1799 = vmatmul.mubr.msk.bf16.vlgmr.msra.gmra.mrb[24].mxu1 %vm450_vm3, %v1308_v7 }
 0x94a   : > { %v1350_v9 = vpop.f32.mrb[24].mxu1 }
 0x94b   : > { %v1357_v10 = vadd.f32 %v1350_v9, %v1306_v8  ;;  %v1800_v11 = vpop.f32.mrb[25].mxu1 }
 0x94c   : > { %v1353_v13 = vpop.f32.mrb[26].mxu1 }
 0x94d   : > { %1359 = vst.msk [vmem:[#allocation3] sm:$0xff] %vm379_vm1, %v1357_v10  ;;  %v1358_v14 = vadd.f32 %v1353_v13, %v1307_v12  ;;  %v1801_v15 = vpop.f32.mrb[27].mxu1 }
 0x94f   : > { %1360 = vst.msk [vmem:[#allocation3 + $0x8] sm:$0xff] %vm379_vm1, %v1358_v14 }
 0x954   : > { %v1361_v18 = vld [vmem:[#allocation3] sm:$0xff] }
 0x955   : > { %v1370_v19 = vadd.f32 %v1601_v17, %v1361_v18 }
 0x956   : > { %v1362_v20 = vld [vmem:[#allocation3 + $0x8] sm:$0xff] }
 0x957   : > { %v1371_v21 = vadd.f32 %v1601_v17, %v1362_v20  ;;  %1372 = vst.msk [vmem:[%s326_s30] sm:$0xff] %vm379_vm1, %v1370_v19 }
 0x959   : > { %1373 = vst.msk [vmem:[%s326_s30 + $0x8] sm:$0xff] %vm379_vm1, %v1371_v21 }
 0x95a   : > { %1945 = shalt.err (!%p1942_p5)
}
 0x95b   : > { %s1946_s12 = scalar_lea.hbm %s2310_s16, 256  ;;  %s1950_s23 = scalar_lea.hbm %s2369_s7, 512 }
 0x95c   : > { %p1947_p6 = scmp.ne.s32.totalorder %s2310_s16, %s1946_s12  ;;  %p1951_p10 = scmp.lt.u32.totalorder %s2310_s16, %s2369_s7 }
 0x95d   : > { %p1952_p11 = scmp.lt.u32.totalorder %s1950_s23, %s1946_s12  ;;  %p1954_p13 = scmp.lt.u32.totalorder %s1946_s12, %s2310_s16 }
 0x95e   : > { %p1948_p7 = pnand %p1947_p6, %p2101_p4 }
 0x95f   : > { %p1953_p12 = por %p1952_p11, %p1951_p10 }
 0x960   : > { %p1949_p9 = pneg %p1948_p7 }
 0x961   : > { %p1955_p0 = por %p1954_p13, %p1953_p12 }
 0x963   : > { %p1956_p1 = pnand %p1955_p0, %p1949_p9 }
 0x965   : > { %1959 = shalt.err (!%p1956_p1)
}
 0x966   : > { %s2019_s15 = smov 128   ;;  %s2020_s17 = smov 8  }
 0x967   : > { %1802 = dma.vmem_to_hbm [thread:$0]  (%p2101_p4), %s2312_s8, 256, %s2310_s16, %s2316_s27, %s2019_s15, %s2019_s15, %s2020_s17  }
 0x968 PF: > { %p1808_p2 = scmp.ge.s32.totalorder %s2010_s29, 2  ;;  %s1405_s18 = sand.u32 1, %s1990_s24  }
 0x969   : > { %s1406_s19 = scalar_lea.sflag [#allocation5], %s1405_s18 }
 0x96a   : > { %p1805_p3 = pnand %p1808_p2, %p2108_p8 }
 0x96c   : > { %1985 = dma.done.wait (!%p1805_p3), %s1406_s19, 256  }
 0x96d   : > { %1987 = vsyncadd (!%p1805_p3), %s1406_s19, 4294967040  ;;  %s20_s29 = sadd.s32 1, %s2010_s29   ;;  %s2372_s24 = smov %s1994_s25 }
 0x96e   : > { %p17_p5 = scmp.ge.s32.totalorder %s20_s29, 4   ;;  %s2373_s25 = smov %s1998_s26 }
 0x96f   : > { %s2374_s26 = smov %s2114_s14  ;;  %s2375_s27 = smov %s2006_s28 }
 0x970   : > { %s2376_s28 = smov %s2378_s9  ;;  %19 = sbr.rel (!%p17_p5) target bundleno = 4 (0x4), region = 95 }
 0x977   :  { %1411 = vsyncpa [#allocation5], 1 }
 0x978   :  { %1413 = vsyncpa [#allocation5 + $0x1], 1 }

</bundles_post_ra>
